<compile_context>
chip_gen: v7x
topology: tpu7x:2x2x1
jax: 0.10.0
libtpu: 0.0.40
codegen_flags: <defaults>
</compile_context>

<pallas_src>
import functools

import jax
import jax.numpy as jnp
from jax.experimental import pallas as pl
from jax.experimental.pallas import tpu as pltpu

BN_EPS = 1e-5


def _cdiv(a, b):
    return -(-a // b)


# ----------------------------------------------------------------------------- kernel 1

def _conv1x1_bn_relu_kernel(x_ref, w_ref, sc_ref, sh_ref, o_ref):
    """1x1 conv as a flat matmul + folded-BN scale/shift + ReLU (bf16 MXU, f32 epilogue)."""
    x = x_ref[...].astype(jnp.bfloat16)
    acc = jnp.dot(x, w_ref[...], preferred_element_type=jnp.float32)
    o_ref[...] = jnp.maximum(acc * sc_ref[...] + sh_ref[...], 0.0).astype(o_ref.dtype)


def conv1x1_bn_relu(x_nhwc, w, scale, shift, out_dtype=jnp.bfloat16):
    """conv1 (1x1, stride 1) + BN + ReLU with batch & spatial folded into the matmul M dim."""
    N, H, W, Cin = x_nhwc.shape
    Cout = w.shape[-1]
    M = N * H * W
    xf = x_nhwc.reshape(M, Cin)                       # stays f32; cast in-kernel
    wf = w.reshape(Cin, Cout).astype(jnp.bfloat16)
    TM = next((t for t in (1024, 512, 256, 128, 64, 32, 16, 8) if M % t == 0), M)
    out = pl.pallas_call(
        _conv1x1_bn_relu_kernel,
        grid=(M // TM,),
        in_specs=[
            pl.BlockSpec((TM, Cin), lambda i: (i, 0)),
            pl.BlockSpec((Cin, Cout), lambda i: (0, 0)),
            pl.BlockSpec((1, Cout), lambda i: (0, 0)),
            pl.BlockSpec((1, Cout), lambda i: (0, 0)),
        ],
        out_specs=pl.BlockSpec((TM, Cout), lambda i: (i, 0)),
        out_shape=jax.ShapeDtypeStruct((M, Cout), out_dtype),
        compiler_params=pltpu.CompilerParams(
            dimension_semantics=("parallel",),
            vmem_limit_bytes=32 * 1024 * 1024),
    )(xf, wf,
      scale.reshape(1, Cout).astype(jnp.float32),
      shift.reshape(1, Cout).astype(jnp.float32))
    return out.reshape(N, H, W, Cout)


# ----------------------------------------------------------------------------- kernel 2

def _bottleneck_tail_kernel(o1s_ref, xid_ref, w2_ref, sc2_ref, sh2_ref,
                            w3_ref, sc3_ref, sh3_ref, *rest,
                            KH, KW, THo, Wo, Hps, stride, dilation, has_down):
    """conv2(3x3, stride/dilation via phase planes) + BN2 + ReLU + conv3(1x1) + BN3
       + (downsample 1x1 + BNd | identity) + residual add + final ReLU."""
    if has_down:
        wd_ref, scd_ref, shd_ref, o_ref = rest
    else:
        (o_ref,) = rest

    width = sc2_ref.shape[-1]
    Cout = sc3_ref.shape[-1]
    Cx = xid_ref.shape[-1]

    r0 = pl.multiple_of(pl.program_id(1) * THo, THo)   # output-row tile start

    # ---- conv2: 9 per-(kh,kw) matmuls, all loads contiguous (stride folded into layout),
    #      accumulation in a local f32 value (no VMEM scratch) ----
    acc = jnp.zeros((THo * Wo, width), jnp.float32)
    for kh in range(KH):
        for kw in range(KW):
            ph = ((kh * dilation) % stride) * stride + ((kw * dilation) % stride)
            rbase = ph * Hps + (kh * dilation) // stride
            cbase = (kw * dilation) // stride
            tap = o1s_ref[pl.ds(rbase + r0, THo), pl.ds(cbase, Wo), :]   # (THo, Wo, width) bf16
            acc = acc + jnp.dot(tap.reshape(THo * Wo, width),
                                w2_ref[kh * KW + kw],
                                preferred_element_type=jnp.float32)
    h = jnp.maximum(acc * sc2_ref[...] + sh2_ref[...], 0.0)

    # ---- conv3: 1x1 + BN3 ----
    y = jnp.dot(h.astype(jnp.bfloat16), w3_ref[...],
                preferred_element_type=jnp.float32)
    y = y * sc3_ref[...] + sh3_ref[...]

    # ---- identity / downsample (row-tiled input block), residual add, final ReLU ----
    xi = xid_ref[...].reshape(THo * Wo, Cx)
    if has_down:
        idn = jnp.dot(xi.astype(jnp.bfloat16), wd_ref[...],
                      preferred_element_type=jnp.float32)
        idn = idn * scd_ref[...] + shd_ref[...]
    else:
        idn = xi.astype(jnp.float32)

    y = jnp.maximum(y + idn, 0.0)
    o_ref[...] = y.reshape(THo, Wo, Cout).astype(o_ref.dtype)


# ----------------------------------------------------------------------------- wrappers

def _pad_and_phase_split(o1, stride, dilation):
    """Zero-pad out1 by `dilation` and space-to-depth by `stride` so that every conv2 tap
    becomes a contiguous (row, col) window.  Phase planes are folded into the row axis:
    padded position (R, C) lives at row ((R % s)*s + (C % s)) * Hps + R//s, col C//s."""
    N, H, W, C = o1.shape
    pad = dilation
    Hps = _cdiv(H + 2 * pad, stride)
    Wps = _cdiv(W + 2 * pad, stride)
    o1p = jnp.pad(o1, ((0, 0),
                       (pad, Hps * stride - H - pad),
                       (pad, Wps * stride - W - pad),
                       (0, 0)))
    if stride > 1:
        o1p = o1p.reshape(N, Hps, stride, Wps, stride, C)
        o1p = jnp.transpose(o1p, (0, 2, 4, 1, 3, 5))
        o1p = o1p.reshape(N, stride * stride * Hps, Wps, C)
    return o1p, Hps, Wps


def bottleneck_forward(x_nchw, params, out_dtype=jnp.float32):
    """Bottleneck: 1x1-BN-ReLU -> 3x3(stride,dilation)-BN-ReLU -> 1x1-BN -> +identity -> ReLU."""
    stride = params["stride"]
    dilation = params["dilation"]
    assert params.get("groups", 1) == 1   # TODO(synk): grouped conv2 not implemented
    x = jnp.transpose(x_nchw, (0, 2, 3, 1)).astype(jnp.float32)     # NCHW -> NHWC
    N, H, W, Cin = x.shape
    width = params["w1"].shape[-1]
    Cout = params["w3"].shape[-1]
    KH = KW = 3
    pad = dilation
    Ho = (H + 2 * pad - dilation * (KH - 1) - 1) // stride + 1
    Wo = (W + 2 * pad - dilation * (KW - 1) - 1) // stride + 1
    has_down = "wd" in params
    if not has_down:
        assert stride == 1 and Cin == Cout

    # Kernel 1: conv1 (1x1) + bn1 + relu (bf16 output).
    out1 = conv1x1_bn_relu(x, params["w1"], *params["bn1"])

    # Single layout pass: padding + stride phase-split (contiguous in-kernel taps).
    o1s, Hps, Wps = _pad_and_phase_split(out1, stride, dilation)

    # Identity/downsample input, already spatially subsampled so K2 reads contiguous rows.
    if stride > 1:
        x_id = x[:, ::stride, ::stride, :].astype(jnp.bfloat16)
    else:
        x_id = x                                           # f32; cast in-kernel if needed
    Cx = x_id.shape[-1]

    THo = next(t for t in (64, 32, 16, 8, 4, 2, 1) if Ho % t == 0)
    RT = Ho // THo

    w2 = params["w2"].astype(jnp.bfloat16).reshape(KH * KW, width, width)
    sc2, sh2 = [a.reshape(1, width).astype(jnp.float32) for a in params["bn2"]]
    w3 = params["w3"].astype(jnp.bfloat16)
    sc3, sh3 = [a.reshape(1, Cout).astype(jnp.float32) for a in params["bn3"]]

    in_specs = [
        pl.BlockSpec((None, stride * stride * Hps, Wps, width), lambda n, t: (n, 0, 0, 0)),
        pl.BlockSpec((None, THo, Wo, Cx), lambda n, t: (n, t, 0, 0)),
        pl.BlockSpec((KH * KW, width, width), lambda n, t: (0, 0, 0)),
        pl.BlockSpec((1, width), lambda n, t: (0, 0)),
        pl.BlockSpec((1, width), lambda n, t: (0, 0)),
        pl.BlockSpec((width, Cout), lambda n, t: (0, 0)),
        pl.BlockSpec((1, Cout), lambda n, t: (0, 0)),
        pl.BlockSpec((1, Cout), lambda n, t: (0, 0)),
    ]
    args = [o1s, x_id, w2, sc2, sh2, w3, sc3, sh3]
    if has_down:
        wd = params["wd"].astype(jnp.bfloat16)
        scd, shd = [a.reshape(1, Cout).astype(jnp.float32) for a in params["bnd"]]
        in_specs += [pl.BlockSpec((Cin, Cout), lambda n, t: (0, 0)),
                     pl.BlockSpec((1, Cout), lambda n, t: (0, 0)),
                     pl.BlockSpec((1, Cout), lambda n, t: (0, 0))]
        args += [wd, scd, shd]

    kernel = functools.partial(
        _bottleneck_tail_kernel, KH=KH, KW=KW, THo=THo, Wo=Wo, Hps=Hps,
        stride=stride, dilation=dilation, has_down=has_down)

    out = pl.pallas_call(
        kernel,
        grid=(N, RT),
        in_specs=in_specs,
        out_specs=pl.BlockSpec((None, THo, Wo, Cout), lambda n, t: (n, t, 0, 0)),
        out_shape=jax.ShapeDtypeStruct((N, Ho, Wo, Cout), out_dtype),
        compiler_params=pltpu.CompilerParams(
            dimension_semantics=("parallel", "arbitrary"),
            vmem_limit_bytes=32 * 1024 * 1024),
    )(*args)
    return jnp.transpose(out, (0, 3, 1, 2))               # NHWC -> NCHW


# ----------------------------------------------------------------------------- params

def fold_bn(gamma, beta, mean, var, eps=BN_EPS):
    scale = gamma / jnp.sqrt(var + eps)
    return scale, beta - mean * scale


def default_bn(c):
    return fold_bn(jnp.ones((c,), jnp.float32), jnp.zeros((c,), jnp.float32),
                   jnp.zeros((c,), jnp.float32), jnp.ones((c,), jnp.float32))


def conv_init(key, shape, fan_in):
    bound = (1.0 / fan_in) ** 0.5
    return jax.random.uniform(key, shape, jnp.float32, -bound, bound)


def make_bottleneck_params(key, inplanes, planes, stride=1, dilation=1,
                           groups=1, base_width=64, expansion=4):
    width = int(planes * (base_width / 64.0)) * groups
    cout = planes * expansion
    k = jax.random.split(key, 4)
    p = {
        "stride": stride, "dilation": dilation, "groups": groups,
        "w1": conv_init(k[0], (inplanes, width), inplanes),
        "bn1": default_bn(width),
        "w2": conv_init(k[1], (3, 3, width, width), 9 * width),
        "bn2": default_bn(width),
        "w3": conv_init(k[2], (width, cout), width),
        "bn3": default_bn(cout),
    }
    if stride != 1 or inplanes != cout:                    # standard downsample: 1x1 conv + BN
        p["wd"] = conv_init(k[3], (inplanes, cout), inplanes)
        p["bnd"] = default_bn(cout)
    return p


# ----------------------------------------------------------------------------- reference

def reference_bottleneck(x_nchw, params):
    """Pure-JAX (f32, HIGHEST precision) reference of the same Bottleneck forward."""
    s, d = params["stride"], params["dilation"]
    x = x_nchw.astype(jnp.float32)

    def conv(inp, w_hwio, stride, padding, dil=1):
        return jax.lax.conv_general_dilated(
            inp, w_hwio, window_strides=(stride, stride),
            padding=((padding, padding), (padding, padding)),
            rhs_dilation=(dil, dil),
            dimension_numbers=("NCHW", "HWIO", "NCHW"),
            precision=jax.lax.Precision.HIGHEST)

    def bn(inp, sc_sh):
        sc, sh = sc_sh
        return inp * sc[None, :, None, None] + sh[None, :, None, None]

    w1 = params["w1"].reshape(1, 1, *params["w1"].shape)
    out = jax.nn.relu(bn(conv(x, w1, 1, 0), params["bn1"]))
    out = jax.nn.relu(bn(conv(out, params["w2"], s, d, d), params["bn2"]))
    w3 = params["w3"].reshape(1, 1, *params["w3"].shape)
    out = bn(conv(out, w3, 1, 0), params["bn3"])
    if "wd" in params:
        wd = params["wd"].reshape(1, 1, *params["wd"].shape)
        identity = bn(conv(x, wd, s, 0), params["bnd"])
    else:
        identity = x
    return jax.nn.relu(out + identity)


# ----------------------------------------------------------------------------- main

if __name__ == "__main__":
    key = jax.random.PRNGKey(0)
    kp1, kp2, kp3, kx1, kx2, kx3 = jax.random.split(key, 6)

    cases = [
        # (params, NCHW input shape, expected output shape)
        (make_bottleneck_params(kp1, 16, 8, stride=2), (2, 16, 16, 16), (2, 32, 8, 8)),   # strided downsample
        (make_bottleneck_params(kp2, 32, 8, stride=1), (2, 32, 16, 16), (2, 32, 16, 16)), # identity path
        (make_bottleneck_params(kp3, 16, 8, stride=1, dilation=2), (2, 16, 16, 16), (2, 32, 16, 16)),  # dilated
    ]
    xkeys = [kx1, kx2, kx3]

    for (params, in_shape, out_shape), xk in zip(cases, xkeys):
        x = jax.random.normal(xk, in_shape, jnp.float32)          # NCHW like PyTorch
        out = bottleneck_forward(x, params)
        jax.block_until_ready(out)

        assert out.shape == out_shape, (out.shape, out_shape)
        assert bool(jnp.all(jnp.isfinite(out)))

        ref = reference_bottleneck(x, params)
        max_err = float(jnp.max(jnp.abs(out - ref)))
        tol = 2e-2 + 2e-2 * float(jnp.max(jnp.abs(ref)))          # abs + relative (bf16 matmuls)
        assert max_err < tol, f"max abs err vs reference = {max_err} (tol {tol})"

    print("KERNEL_OK")
</pallas_src>

<mosaic_0001>
module attributes {stable_mosaic.version = 11 : i64} {
  func.func @_conv1x1_bn_relu_kernel(%arg0: i32, %arg1: memref<512x16xf32, #tpu.memory_space<vmem>>, %arg2: memref<16x8xbf16, #tpu.memory_space<vmem>>, %arg3: memref<1x8xf32, #tpu.memory_space<vmem>>, %arg4: memref<1x8xf32, #tpu.memory_space<vmem>>, %arg5: memref<512x8xbf16, #tpu.memory_space<vmem>>) attributes {dimension_semantics = [#tpu.dimension_semantics<parallel>], iteration_bounds = array<i64: 1>, scalar_prefetch = 0 : i64, scratch_operands = 0 : i64, tpu.core_type = #tpu.core_type<tc>, window_params = [{transform_indices = @transform_0, window_bounds = array<i64: 512, 16>}, {pipeline_mode = #tpu.pipeline_mode<synchronous>, transform_indices = @transform_1, window_bounds = array<i64: 16, 8>}, {pipeline_mode = #tpu.pipeline_mode<synchronous>, transform_indices = @transform_2, window_bounds = array<i64: 1, 8>}, {pipeline_mode = #tpu.pipeline_mode<synchronous>, transform_indices = @transform_3, window_bounds = array<i64: 1, 8>}, {transform_indices = @transform_4, window_bounds = array<i64: 512, 8>}]} {
    %c0 = arith.constant 0 : index
    %c0_0 = arith.constant 0 : index
    %0 = vector.load %arg1[%c0, %c0_0] : memref<512x16xf32, #tpu.memory_space<vmem>>, vector<512x16xf32>
    %1 = arith.truncf %0 : vector<512x16xf32> to vector<512x16xbf16>
    %c0_1 = arith.constant 0 : index
    %c0_2 = arith.constant 0 : index
    %2 = vector.load %arg2[%c0_1, %c0_2] : memref<16x8xbf16, #tpu.memory_space<vmem>>, vector<16x8xbf16>
    %cst = arith.constant dense<0.000000e+00> : vector<512x8xf32>
    %3 = tpu.matmul %1, %2, %cst {dimension_numbers = #tpu.dot_dimension_numbers<[1], [0], [0], [1], [0, 0, 1, 1], [], []>} : vector<512x16xbf16>, vector<16x8xbf16>, vector<512x8xf32> -> vector<512x8xf32>
    %c0_3 = arith.constant 0 : index
    %c0_4 = arith.constant 0 : index
    %4 = vector.load %arg3[%c0_3, %c0_4] : memref<1x8xf32, #tpu.memory_space<vmem>>, vector<1x8xf32>
    %5 = vector.broadcast %4 : vector<1x8xf32> to vector<512x8xf32>
    %6 = arith.mulf %3, %5 : vector<512x8xf32>
    %c0_5 = arith.constant 0 : index
    %c0_6 = arith.constant 0 : index
    %7 = vector.load %arg4[%c0_5, %c0_6] : memref<1x8xf32, #tpu.memory_space<vmem>>, vector<1x8xf32>
    %8 = vector.broadcast %7 : vector<1x8xf32> to vector<512x8xf32>
    %9 = arith.addf %6, %8 : vector<512x8xf32>
    %cst_7 = arith.constant 0.000000e+00 : f32
    %10 = vector.broadcast %cst_7 : f32 to vector<512x8xf32>
    %11 = arith.maximumf %9, %10 : vector<512x8xf32>
    %12 = arith.truncf %11 : vector<512x8xf32> to vector<512x8xbf16>
    %c0_8 = arith.constant 0 : index
    %c0_9 = arith.constant 0 : index
    %13 = vector.load %arg5[%c0_8, %c0_9] : memref<512x8xbf16, #tpu.memory_space<vmem>>, vector<512x8xbf16>
    tpu.vector_store %arg5[%c0_8, %c0_9], %12 {strides = array<i32>} : memref<512x8xbf16, #tpu.memory_space<vmem>>, vector<512x8xbf16>,
    return
  }
  func.func @transform_0(%arg0: i32) -> (i32, i32) {
    %c0_i32 = arith.constant 0 : i32
    %c0_i32_0 = arith.constant 0 : i32
    return %arg0, %c0_i32 : i32, i32
  }
  func.func @transform_1(%arg0: i32) -> (i32, i32) {
    %c0_i32 = arith.constant 0 : i32
    %c0_i32_0 = arith.constant 0 : i32
    %c0_i32_1 = arith.constant 0 : i32
    return %c0_i32, %c0_i32_0 : i32, i32
  }
  func.func @transform_2(%arg0: i32) -> (i32, i32) {
    %c0_i32 = arith.constant 0 : i32
    %c0_i32_0 = arith.constant 0 : i32
    %c0_i32_1 = arith.constant 0 : i32
    return %c0_i32, %c0_i32_0 : i32, i32
  }
  func.func @transform_3(%arg0: i32) -> (i32, i32) {
    %c0_i32 = arith.constant 0 : i32
    %c0_i32_0 = arith.constant 0 : i32
    %c0_i32_1 = arith.constant 0 : i32
    return %c0_i32, %c0_i32_0 : i32, i32
  }
  func.func @transform_4(%arg0: i32) -> (i32, i32) {
    %c0_i32 = arith.constant 0 : i32
    %c0_i32_0 = arith.constant 0 : i32
    return %arg0, %c0_i32 : i32, i32
  }
}

</mosaic_0001>

<bundles_post_ra>
// kernel: tpu_custom_call.1
= control target key start
LH: loop header
LB: loop body
LE: loop exit
PB: predicated region body
PF: predicated region fallthrough
CT: control target
= control target key end

     0   :  { %vm122_vm0 = vcmask 130048   ;;  %vm970_vm1 = vcmask 60416   ;;  %s1950_s1 = inlined_call_operand.vmem [shape: bf16[16,8], index: 1, kind: input, shape index: {}]   ;;  %s1951_s0 = inlined_call_operand.vmem [shape: f32[512,16], index: 0, kind: input, shape index: {}]   ;;  %s1952_s2 = inlined_call_operand.vmem [shape: f32[1,8], index: 2, kind: input, shape index: {}]   ;;  %s1953_s3 = inlined_call_operand.vmem [shape: f32[1,8], index: 3, kind: input, shape index: {}]   ;;  %s1954_s4 = inlined_call_operand.vmem [shape: bf16[512,8], index: 4, kind: output, shape index: {}]  }
   0x1   :  { %v1303_v0 = vld [vmem:[%s1950_s1] sm:$0xff]   ;;  %v19_v2 = vld [vmem:[%s1951_s0 + $0x8] sm:$0xff]  ;;  %v20_v6 = vld [vmem:[%s1951_s0 + $0x10] sm:$0xff] }
   0x2   :  { %v18_v1 = vld [vmem:[%s1951_s0] sm:$0xff]  ;;  %1235 = vmatprep.subr.bf16.mxu0 %v1303_v0  ;;  %1301 = vmatprep.subr.bf16.mxu1 %v1303_v0  ;;  %v51_v5 = vld [vmem:[%s1951_s0 + $0x108] sm:$0xff]  ;;  %v21_v7 = vld [vmem:[%s1951_s0 + $0x18] sm:$0xff] }
   0x3   :  { %v50_v3 = vld [vmem:[%s1951_s0 + $0x100] sm:$0xff]  ;;  %v82_v4 = vpack.c.bf16 %v19_v2, %v18_v1  ;;  %1236 = vmatpush3.bf16.msra.mxu0 %v1303_v0  ;;  %1302 = vmatpush3.bf16.msra.mxu1 %v1303_v0  ;;  %v83_v9 = vpack.c.bf16 %v21_v7, %v20_v6  ;;  %v52_v10 = vld [vmem:[%s1951_s0 + $0x110] sm:$0xff]  ;;  %v53_v11 = vld [vmem:[%s1951_s0 + $0x118] sm:$0xff] }
   0x4   :  { %v98_v8 = vpack.c.bf16 %v51_v5, %v50_v3  ;;  %v22_v12 = vld [vmem:[%s1951_s0 + $0x20] sm:$0xff]  ;;  %v99_v13 = vpack.c.bf16 %v53_v11, %v52_v10  ;;  %v23_v14 = vld [vmem:[%s1951_s0 + $0x28] sm:$0xff]  ;;  %v24_v19 = vld [vmem:[%s1951_s0 + $0x30] sm:$0xff] }
   0x5   :  { %1237 = vmatprep.mubr.msk.bf16.mxu0 %vm122_vm0, %v82_v4  ;;  %v54_v15 = vld [vmem:[%s1951_s0 + $0x120] sm:$0xff]  ;;  %v55_v16 = vld [vmem:[%s1951_s0 + $0x128] sm:$0xff]  ;;  %v84_v17 = vpack.c.bf16 %v23_v14, %v22_v12  ;;  %v25_v20 = vld [vmem:[%s1951_s0 + $0x38] sm:$0xff] }
   0x6   :  { %1269 = vmatprep.mubr.msk.bf16.mxu1 %vm122_vm0, %v98_v8  ;;  %v100_v18 = vpack.c.bf16 %v55_v16, %v54_v15  ;;  %1238 = vmatmul.mubr.msk.bf16.vlgmr.msra.gmra.mrb[0].mxu0 %vm122_vm0, %v83_v9  ;;  %v56_v21 = vld [vmem:[%s1951_s0 + $0x130] sm:$0xff]  ;;  %v57_v22 = vld [vmem:[%s1951_s0 + $0x138] sm:$0xff]  ;;  %v26_v23 = vld [vmem:[%s1951_s0 + $0x40] sm:$0xff]  ;;  %v85_v27 = vpack.c.bf16 %v25_v20, %v24_v19 }
   0x7   :  { %1270 = vmatmul.mubr.msk.bf16.vlgmr.msra.gmra.mrb[0].mxu1 %vm122_vm0, %v99_v13  ;;  %1241 = vmatprep.mubr.msk.bf16.mxu0 %vm122_vm0, %v84_v17  ;;  %v27_v24 = vld [vmem:[%s1951_s0 + $0x48] sm:$0xff]  ;;  %v58_v25 = vld [vmem:[%s1951_s0 + $0x140] sm:$0xff]  ;;  %v101_v28 = vpack.c.bf16 %v57_v22, %v56_v21  ;;  %v28_v31 = vld [vmem:[%s1951_s0 + $0x50] sm:$0xff] }
   0x8   :  { %1273 = vmatprep.mubr.msk.bf16.mxu1 %vm122_vm0, %v100_v18  ;;  %v59_v26 = vld [vmem:[%s1951_s0 + $0x148] sm:$0xff]  ;;  %v86_v29 = vpack.c.bf16 %v27_v24, %v26_v23  ;;  %v29_v32 = vld [vmem:[%s1951_s0 + $0x58] sm:$0xff]  ;;  %v60_v33 = vld [vmem:[%s1951_s0 + $0x150] sm:$0xff] }
   0x9   :  { %v102_v30 = vpack.c.bf16 %v59_v26, %v58_v25  ;;  %v61_v34 = vld [vmem:[%s1951_s0 + $0x158] sm:$0xff]  ;;  %v30_v35 = vld [vmem:[%s1951_s0 + $0x60] sm:$0xff]  ;;  %v31_v36 = vld [vmem:[%s1951_s0 + $0x68] sm:$0xff]  ;;  %v87_v39 = vpack.c.bf16 %v29_v32, %v28_v31 }
   0xa   :  { %v62_v37 = vld [vmem:[%s1951_s0 + $0x160] sm:$0xff]  ;;  %v63_v38 = vld [vmem:[%s1951_s0 + $0x168] sm:$0xff]  ;;  %v103_v40 = vpack.c.bf16 %v61_v34, %v60_v33  ;;  %v88_v41 = vpack.c.bf16 %v31_v36, %v30_v35  ;;  %v32_v43 = vld [vmem:[%s1951_s0 + $0x70] sm:$0xff] }
   0xb   :  { %v104_v42 = vpack.c.bf16 %v63_v38, %v62_v37  ;;  %v33_v44 = vld [vmem:[%s1951_s0 + $0x78] sm:$0xff]  ;;  %v64_v45 = vld [vmem:[%s1951_s0 + $0x170] sm:$0xff]  ;;  %v34_v47 = vld [vmem:[%s1951_s0 + $0x80] sm:$0xff] }
   0xc   :  { %v65_v46 = vld [vmem:[%s1951_s0 + $0x178] sm:$0xff]  ;;  %v35_v48 = vld [vmem:[%s1951_s0 + $0x88] sm:$0xff]  ;;  %v66_v49 = vld [vmem:[%s1951_s0 + $0x180] sm:$0xff]  ;;  %v89_v51 = vpack.c.bf16 %v33_v44, %v32_v43 }
   0xd   :  { %v67_v50 = vld [vmem:[%s1951_s0 + $0x188] sm:$0xff]  ;;  %v105_v52 = vpack.c.bf16 %v65_v46, %v64_v45  ;;  %v90_v53 = vpack.c.bf16 %v35_v48, %v34_v47  ;;  %v36_v55 = vld [vmem:[%s1951_s0 + $0x90] sm:$0xff]  ;;  %v37_v56 = vld [vmem:[%s1951_s0 + $0x98] sm:$0xff] }
   0xe   :  { %1242 = vmatmul.mubr.msk.bf16.gmra.mrb[4].mxu0 %vm122_vm0, %v85_v27  ;;  %v106_v54 = vpack.c.bf16 %v67_v50, %v66_v49  ;;  %v68_v57 = vld [vmem:[%s1951_s0 + $0x190] sm:$0xff]  ;;  %v69_v58 = vld [vmem:[%s1951_s0 + $0x198] sm:$0xff]  ;;  %v38_v59 = vld [vmem:[%s1951_s0 + $0xa0] sm:$0xff]  ;;  %v91_v63 = vpack.c.bf16 %v37_v56, %v36_v55 }
   0xf   :  { %1274 = vmatmul.mubr.msk.bf16.gmra.mrb[4].mxu1 %vm122_vm0, %v101_v28  ;;  %1245 = vmatprep.mubr.msk.bf16.mxu0 %vm122_vm0, %v86_v29  ;;  %v39_v60 = vld [vmem:[%s1951_s0 + $0xa8] sm:$0xff]  ;;  %v70_v61 = vld [vmem:[%s1951_s0 + $0x1a0] sm:$0xff]  ;;  %v107_v0 = vpack.c.bf16 %v69_v58, %v68_v57  ;;  %v40_v3 = vld [vmem:[%s1951_s0 + $0xb0] sm:$0xff] }
  0x10   :  { %1277 = vmatprep.mubr.msk.bf16.mxu1 %vm122_vm0, %v102_v30  ;;  %v71_v62 = vld [vmem:[%s1951_s0 + $0x1a8] sm:$0xff]  ;;  %v92_v1 = vpack.c.bf16 %v39_v60, %v38_v59  ;;  %v41_v4 = vld [vmem:[%s1951_s0 + $0xb8] sm:$0xff]  ;;  %v72_v5 = vld [vmem:[%s1951_s0 + $0x1b0] sm:$0xff] }
  0x11   :  { %v108_v2 = vpack.c.bf16 %v71_v62, %v70_v61  ;;  %v73_v6 = vld [vmem:[%s1951_s0 + $0x1b8] sm:$0xff]  ;;  %v42_v7 = vld [vmem:[%s1951_s0 + $0xc0] sm:$0xff]  ;;  %v43_v8 = vld [vmem:[%s1951_s0 + $0xc8] sm:$0xff]  ;;  %v93_v11 = vpack.c.bf16 %v41_v4, %v40_v3 }
  0x12   :  { %v74_v9 = vld [vmem:[%s1951_s0 + $0x1c0] sm:$0xff]  ;;  %v75_v10 = vld [vmem:[%s1951_s0 + $0x1c8] sm:$0xff]  ;;  %v109_v12 = vpack.c.bf16 %v73_v6, %v72_v5  ;;  %v94_v13 = vpack.c.bf16 %v43_v8, %v42_v7  ;;  %v44_v15 = vld [vmem:[%s1951_s0 + $0xd0] sm:$0xff] }
  0x13   :  { %v110_v14 = vpack.c.bf16 %v75_v10, %v74_v9  ;;  %v45_v16 = vld [vmem:[%s1951_s0 + $0xd8] sm:$0xff]  ;;  %v76_v17 = vld [vmem:[%s1951_s0 + $0x1d0] sm:$0xff]  ;;  %v46_v19 = vld [vmem:[%s1951_s0 + $0xe0] sm:$0xff] }
  0x14   :  { %v77_v18 = vld [vmem:[%s1951_s0 + $0x1d8] sm:$0xff]  ;;  %v47_v20 = vld [vmem:[%s1951_s0 + $0xe8] sm:$0xff]  ;;  %v78_v21 = vld [vmem:[%s1951_s0 + $0x1e0] sm:$0xff]  ;;  %v95_v23 = vpack.c.bf16 %v45_v16, %v44_v15 }
  0x15   :  { %v79_v22 = vld [vmem:[%s1951_s0 + $0x1e8] sm:$0xff]  ;;  %v111_v24 = vpack.c.bf16 %v77_v18, %v76_v17  ;;  %v96_v25 = vpack.c.bf16 %v47_v20, %v46_v19  ;;  %v48_v27 = vld [vmem:[%s1951_s0 + $0xf0] sm:$0xff]  ;;  %v49_v28 = vld [vmem:[%s1951_s0 + $0xf8] sm:$0xff] }
  0x16   :  { %1246 = vmatmul.mubr.msk.bf16.gmra.mrb[8].mxu0 %vm122_vm0, %v87_v39  ;;  %v112_v26 = vpack.c.bf16 %v79_v22, %v78_v21  ;;  %v80_v29 = vld [vmem:[%s1951_s0 + $0x1f0] sm:$0xff]  ;;  %v81_v30 = vld [vmem:[%s1951_s0 + $0x1f8] sm:$0xff]  ;;  %v97_v31 = vpack.c.bf16 %v49_v28, %v48_v27  ;;  %v1559_v33 = vld [vmem:[%s1952_s2] ss:$0 sm:$0xff] }
  0x17   :  { %1278 = vmatmul.mubr.msk.bf16.gmra.mrb[8].mxu1 %vm122_vm0, %v103_v40  ;;  %1249 = vmatprep.mubr.msk.bf16.mxu0 %vm122_vm0, %v88_v41  ;;  %v113_v32 = vpack.c.bf16 %v81_v30, %v80_v29  ;;  %v1564_v35 = vld [vmem:[%s1953_s3] ss:$0 sm:$0xff] }
  0x18   :  { %1281 = vmatprep.mubr.msk.bf16.mxu1 %vm122_vm0, %v104_v42 }
  0x1e   :  { %1250 = vmatmul.mubr.msk.bf16.gmra.mrb[12].mxu0 %vm122_vm0, %v89_v51 }
  0x1f   :  { %1282 = vmatmul.mubr.msk.bf16.gmra.mrb[12].mxu1 %vm122_vm0, %v105_v52  ;;  %1253 = vmatprep.mubr.msk.bf16.mxu0 %vm122_vm0, %v90_v53 }
  0x20   :  { %1285 = vmatprep.mubr.msk.bf16.mxu1 %vm122_vm0, %v106_v54 }
  0x26   :  { %1254 = vmatmul.mubr.msk.bf16.gmra.mrb[16].mxu0 %vm122_vm0, %v91_v63 }
  0x27   :  { %1286 = vmatmul.mubr.msk.bf16.gmra.mrb[16].mxu1 %vm122_vm0, %v107_v0  ;;  %1257 = vmatprep.mubr.msk.bf16.mxu0 %vm122_vm0, %v92_v1 }
  0x28   :  { %1289 = vmatprep.mubr.msk.bf16.mxu1 %vm122_vm0, %v108_v2 }
  0x2e   :  { %1258 = vmatmul.mubr.msk.bf16.gmra.mrb[20].mxu0 %vm122_vm0, %v93_v11 }
  0x2f   :  { %1290 = vmatmul.mubr.msk.bf16.gmra.mrb[20].mxu1 %vm122_vm0, %v109_v12  ;;  %1261 = vmatprep.mubr.msk.bf16.mxu0 %vm122_vm0, %v94_v13 }
  0x30   :  { %1293 = vmatprep.mubr.msk.bf16.mxu1 %vm122_vm0, %v110_v14 }
  0x36   :  { %1262 = vmatmul.mubr.msk.bf16.gmra.mrb[24].mxu0 %vm122_vm0, %v95_v23 }
  0x37   :  { %1294 = vmatmul.mubr.msk.bf16.gmra.mrb[24].mxu1 %vm122_vm0, %v111_v24  ;;  %1265 = vmatprep.mubr.msk.bf16.mxu0 %vm122_vm0, %v96_v25 }
  0x38   :  { %1297 = vmatprep.mubr.msk.bf16.mxu1 %vm122_vm0, %v112_v26 }
  0x3e   :  { %1266 = vmatmul.mubr.msk.bf16.gmra.mrb[28].mxu0 %vm122_vm0, %v97_v31 }
  0x3f   :  { %1298 = vmatmul.mubr.msk.bf16.gmra.mrb[28].mxu1 %vm122_vm0, %v113_v32 }
  0xd9   :  { %v1239_v34 = vpop.f32.mrb[0].mxu0 }
  0xda   :  { %v1271_v36 = vpop.f32.mrb[0].mxu1  ;;  %v517_v37 = vmul.f32 %v1239_v34, %v1559_v33  ;;  %v253_v39 = vpop.f32.mrb[1].mxu0 }
  0xdb   :  { %v549_v38 = vmul.f32 %v1271_v36, %v1559_v33  ;;  %v381_v40 = vpop.f32.mrb[1].mxu1  ;;  %v515_v41 = vmul.f32 %v1559_v33, %v253_v39  ;;  %v1240_v43 = vpop.f32.mrb[2].mxu0 }
  0xdc   :  { %v547_v42 = vmul.f32 %v1559_v33, %v381_v40  ;;  %v1272_v44 = vpop.f32.mrb[2].mxu1  ;;  %v588_v45 = vadd.f32 %v1564_v35, %v517_v37  ;;  %v518_v47 = vmul.f32 %v1240_v43, %v1559_v33  ;;  %v256_v49 = vpop.f32.mrb[3].mxu0 }
  0xdd   :  { %v620_v46 = vadd.f32 %v1564_v35, %v549_v38  ;;  %v550_v48 = vmul.f32 %v1272_v44, %v1559_v33  ;;  %v384_v50 = vpop.f32.mrb[3].mxu1  ;;  %v586_v51 = vadd.f32 %v1564_v35, %v515_v41  ;;  %v516_v53 = vmul.f32 %v1559_v33, %v256_v49 }
  0xde   :  { %v618_v52 = vadd.f32 %v1564_v35, %v547_v42  ;;  %v548_v54 = vmul.f32 %v1559_v33, %v384_v50  ;;  %v652_v55 = vmax.f32 %v588_v45, 0.0  ;;  %v589_v57 = vadd.f32 %v1564_v35, %v518_v47 }
  0xdf   :  { %v684_v56 = vmax.f32 %v620_v46, 0.0  ;;  %v621_v58 = vadd.f32 %v1564_v35, %v550_v48  ;;  %v650_v59 = vmax.f32 %v586_v51, 0.0  ;;  %v587_v61 = vadd.f32 %v1564_v35, %v516_v53 }
  0xe0   :  { %v682_v60 = vmax.f32 %v618_v52, 0.0  ;;  %v619_v62 = vadd.f32 %v1564_v35, %v548_v54  ;;  %v1140_v63 = vpack.c.bf16 %v652_v55, %v652_v55  ;;  %v653_v1 = vmax.f32 %v589_v57, 0.0 }
  0xe1   :  { %v1172_v0 = vpack.c.bf16 %v684_v56, %v684_v56  ;;  %v685_v2 = vmax.f32 %v621_v58, 0.0  ;;  %v1138_v3 = vpack.c.bf16 %v650_v59, %v650_v59  ;;  %v651_v5 = vmax.f32 %v587_v61, 0.0  ;;  %v1243_v7 = vpop.f32.mrb[4].mxu0 }
  0xe2   :  { %v1170_v4 = vpack.c.bf16 %v682_v60, %v682_v60  ;;  %v683_v6 = vmax.f32 %v619_v62, 0.0  ;;  %v1275_v8 = vpop.f32.mrb[4].mxu1  ;;  %973 = vst.msk [vmem:[%s1954_s4 + $0x8] sm:$0xf] %vm970_vm1, %v1140_v63  ;;  %v1141_v9 = vpack.c.bf16 %v653_v1, %v653_v1  ;;  %v521_v11 = vmul.f32 %v1243_v7, %v1559_v33  ;;  %v269_v13 = vpop.f32.mrb[5].mxu0 }
  0xe3   :  { %1005 = vst.msk [vmem:[%s1954_s4 + $0x88] sm:$0xf] %vm970_vm1, %v1172_v0  ;;  %v1173_v10 = vpack.c.bf16 %v685_v2, %v685_v2  ;;  %v553_v12 = vmul.f32 %v1275_v8, %v1559_v33  ;;  %v397_v14 = vpop.f32.mrb[5].mxu1  ;;  %971 = vst.msk [vmem:[%s1954_s4] sm:$0xf] %vm970_vm1, %v1138_v3  ;;  %v1139_v15 = vpack.c.bf16 %v651_v5, %v651_v5  ;;  %v1244_v19 = vpop.f32.mrb[6].mxu0 }
  0xe4   :  { %1003 = vst.msk [vmem:[%s1954_s4 + $0x80] sm:$0xf] %vm970_vm1, %v1170_v4  ;;  %v1171_v16 = vpack.c.bf16 %v683_v6, %v683_v6  ;;  %v519_v17 = vmul.f32 %v1559_v33, %v269_v13  ;;  %v551_v18 = vmul.f32 %v1559_v33, %v397_v14  ;;  %v1276_v20 = vpop.f32.mrb[6].mxu1  ;;  %974 = vst.msk [vmem:[%s1954_s4 + $0xc] sm:$0xf] %vm970_vm1, %v1141_v9  ;;  %v272_v25 = vpop.f32.mrb[7].mxu0 }
  0xe5   :  { %1006 = vst.msk [vmem:[%s1954_s4 + $0x8c] sm:$0xf] %vm970_vm1, %v1173_v10  ;;  %v592_v21 = vadd.f32 %v1564_v35, %v521_v11  ;;  %v624_v22 = vadd.f32 %v1564_v35, %v553_v12  ;;  %v522_v23 = vmul.f32 %v1244_v19, %v1559_v33  ;;  %v554_v24 = vmul.f32 %v1276_v20, %v1559_v33  ;;  %v400_v26 = vpop.f32.mrb[7].mxu1 }
  0xe6   :  { %972 = vst.msk [vmem:[%s1954_s4 + $0x4] sm:$0xf] %vm970_vm1, %v1139_v15  ;;  %1004 = vst.msk [vmem:[%s1954_s4 + $0x84] sm:$0xf] %vm970_vm1, %v1171_v16  ;;  %v590_v27 = vadd.f32 %v1564_v35, %v519_v17  ;;  %v622_v28 = vadd.f32 %v1564_v35, %v551_v18  ;;  %v520_v29 = vmul.f32 %v1559_v33, %v272_v25 }
  0xe7   :  { %v552_v30 = vmul.f32 %v1559_v33, %v400_v26  ;;  %v656_v31 = vmax.f32 %v592_v21, 0.0  ;;  %v688_v32 = vmax.f32 %v624_v22, 0.0  ;;  %v593_v34 = vadd.f32 %v1564_v35, %v522_v23 }
  0xe8   :  { %v625_v36 = vadd.f32 %v1564_v35, %v554_v24  ;;  %v654_v37 = vmax.f32 %v590_v27, 0.0  ;;  %v686_v38 = vmax.f32 %v622_v28, 0.0  ;;  %v591_v39 = vadd.f32 %v1564_v35, %v520_v29 }
  0xe9   :  { %v623_v40 = vadd.f32 %v1564_v35, %v552_v30  ;;  %v1144_v41 = vpack.c.bf16 %v656_v31, %v656_v31  ;;  %v1176_v42 = vpack.c.bf16 %v688_v32, %v688_v32  ;;  %v657_v43 = vmax.f32 %v593_v34, 0.0  ;;  %v1247_v49 = vpop.f32.mrb[8].mxu0 }
  0xea   :  { %v689_v44 = vmax.f32 %v625_v36, 0.0  ;;  %v1142_v45 = vpack.c.bf16 %v654_v37, %v654_v37  ;;  %v1174_v46 = vpack.c.bf16 %v686_v38, %v686_v38  ;;  %v655_v47 = vmax.f32 %v591_v39, 0.0  ;;  %v1279_v50 = vpop.f32.mrb[8].mxu1  ;;  %v285_v55 = vpop.f32.mrb[9].mxu0 }
  0xeb   :  { %v687_v48 = vmax.f32 %v623_v40, 0.0  ;;  %977 = vst.msk [vmem:[%s1954_s4 + $0x18] sm:$0xf] %vm970_vm1, %v1144_v41  ;;  %1009 = vst.msk [vmem:[%s1954_s4 + $0x98] sm:$0xf] %vm970_vm1, %v1176_v42  ;;  %v1145_v51 = vpack.c.bf16 %v657_v43, %v657_v43  ;;  %v525_v53 = vmul.f32 %v1247_v49, %v1559_v33  ;;  %v557_v54 = vmul.f32 %v1279_v50, %v1559_v33  ;;  %v413_v56 = vpop.f32.mrb[9].mxu1 }
  0xec   :  { %v1177_v52 = vpack.c.bf16 %v689_v44, %v689_v44  ;;  %975 = vst.msk [vmem:[%s1954_s4 + $0x10] sm:$0xf] %vm970_vm1, %v1142_v45  ;;  %1007 = vst.msk [vmem:[%s1954_s4 + $0x90] sm:$0xf] %vm970_vm1, %v1174_v46  ;;  %v1143_v57 = vpack.c.bf16 %v655_v47, %v655_v47  ;;  %v523_v59 = vmul.f32 %v1559_v33, %v285_v55  ;;  %v1248_v61 = vpop.f32.mrb[10].mxu0  ;;  %v1280_v62 = vpop.f32.mrb[10].mxu1 }
  0xed   :  { %v1175_v58 = vpack.c.bf16 %v687_v48, %v687_v48  ;;  %v555_v60 = vmul.f32 %v1559_v33, %v413_v56  ;;  %978 = vst.msk [vmem:[%s1954_s4 + $0x1c] sm:$0xf] %vm970_vm1, %v1145_v51  ;;  %v596_v63 = vadd.f32 %v1564_v35, %v525_v53  ;;  %v628_v0 = vadd.f32 %v1564_v35, %v557_v54  ;;  %v288_v3 = vpop.f32.mrb[11].mxu0  ;;  %v416_v4 = vpop.f32.mrb[11].mxu1 }
  0xee   :  { %1010 = vst.msk [vmem:[%s1954_s4 + $0x9c] sm:$0xf] %vm970_vm1, %v1177_v52  ;;  %v526_v1 = vmul.f32 %v1248_v61, %v1559_v33  ;;  %v558_v2 = vmul.f32 %v1280_v62, %v1559_v33  ;;  %976 = vst.msk [vmem:[%s1954_s4 + $0x14] sm:$0xf] %vm970_vm1, %v1143_v57  ;;  %v594_v5 = vadd.f32 %v1564_v35, %v523_v59 }
  0xef   :  { %1008 = vst.msk [vmem:[%s1954_s4 + $0x94] sm:$0xf] %vm970_vm1, %v1175_v58  ;;  %v626_v6 = vadd.f32 %v1564_v35, %v555_v60  ;;  %v524_v7 = vmul.f32 %v1559_v33, %v288_v3  ;;  %v556_v8 = vmul.f32 %v1559_v33, %v416_v4  ;;  %v660_v9 = vmax.f32 %v596_v63, 0.0 }
  0xf0   :  { %v692_v10 = vmax.f32 %v628_v0, 0.0  ;;  %v597_v11 = vadd.f32 %v1564_v35, %v526_v1  ;;  %v629_v12 = vadd.f32 %v1564_v35, %v558_v2  ;;  %v658_v13 = vmax.f32 %v594_v5, 0.0 }
  0xf1   :  { %v690_v14 = vmax.f32 %v626_v6, 0.0  ;;  %v595_v15 = vadd.f32 %v1564_v35, %v524_v7  ;;  %v627_v16 = vadd.f32 %v1564_v35, %v556_v8  ;;  %v1148_v17 = vpack.c.bf16 %v660_v9, %v660_v9  ;;  %v1251_v25 = vpop.f32.mrb[12].mxu0 }
  0xf2   :  { %v1180_v18 = vpack.c.bf16 %v692_v10, %v692_v10  ;;  %v661_v19 = vmax.f32 %v597_v11, 0.0  ;;  %v693_v20 = vmax.f32 %v629_v12, 0.0  ;;  %v1146_v21 = vpack.c.bf16 %v658_v13, %v658_v13  ;;  %v1283_v26 = vpop.f32.mrb[12].mxu1  ;;  %v301_v31 = vpop.f32.mrb[13].mxu0 }
  0xf3   :  { %v1178_v22 = vpack.c.bf16 %v690_v14, %v690_v14  ;;  %v659_v23 = vmax.f32 %v595_v15, 0.0  ;;  %v691_v24 = vmax.f32 %v627_v16, 0.0  ;;  %981 = vst.msk [vmem:[%s1954_s4 + $0x28] sm:$0xf] %vm970_vm1, %v1148_v17  ;;  %v529_v29 = vmul.f32 %v1251_v25, %v1559_v33  ;;  %v429_v32 = vpop.f32.mrb[13].mxu1  ;;  %v1252_v39 = vpop.f32.mrb[14].mxu0 }
  0xf4   :  { %1013 = vst.msk [vmem:[%s1954_s4 + $0xa8] sm:$0xf] %vm970_vm1, %v1180_v18  ;;  %v1149_v27 = vpack.c.bf16 %v661_v19, %v661_v19  ;;  %v1181_v28 = vpack.c.bf16 %v693_v20, %v693_v20  ;;  %v561_v30 = vmul.f32 %v1283_v26, %v1559_v33  ;;  %979 = vst.msk [vmem:[%s1954_s4 + $0x20] sm:$0xf] %vm970_vm1, %v1146_v21  ;;  %v1284_v40 = vpop.f32.mrb[14].mxu1  ;;  %v304_v45 = vpop.f32.mrb[15].mxu0 }
  0xf5   :  { %1011 = vst.msk [vmem:[%s1954_s4 + $0xa0] sm:$0xf] %vm970_vm1, %v1178_v22  ;;  %v1147_v34 = vpack.c.bf16 %v659_v23, %v659_v23  ;;  %v1179_v36 = vpack.c.bf16 %v691_v24, %v691_v24  ;;  %v527_v37 = vmul.f32 %v1559_v33, %v301_v31  ;;  %v559_v38 = vmul.f32 %v1559_v33, %v429_v32  ;;  %v432_v46 = vpop.f32.mrb[15].mxu1 }
  0xf6   :  { %982 = vst.msk [vmem:[%s1954_s4 + $0x2c] sm:$0xf] %vm970_vm1, %v1149_v27  ;;  %1014 = vst.msk [vmem:[%s1954_s4 + $0xac] sm:$0xf] %vm970_vm1, %v1181_v28  ;;  %v600_v41 = vadd.f32 %v1564_v35, %v529_v29  ;;  %v632_v42 = vadd.f32 %v1564_v35, %v561_v30  ;;  %v530_v43 = vmul.f32 %v1252_v39, %v1559_v33 }
  0xf7   :  { %v562_v44 = vmul.f32 %v1284_v40, %v1559_v33  ;;  %980 = vst.msk [vmem:[%s1954_s4 + $0x24] sm:$0xf] %vm970_vm1, %v1147_v34  ;;  %1012 = vst.msk [vmem:[%s1954_s4 + $0xa4] sm:$0xf] %vm970_vm1, %v1179_v36  ;;  %v598_v47 = vadd.f32 %v1564_v35, %v527_v37  ;;  %v630_v48 = vadd.f32 %v1564_v35, %v559_v38 }
  0xf8   :  { %v528_v49 = vmul.f32 %v1559_v33, %v304_v45  ;;  %v560_v50 = vmul.f32 %v1559_v33, %v432_v46  ;;  %v664_v51 = vmax.f32 %v600_v41, 0.0  ;;  %v696_v52 = vmax.f32 %v632_v42, 0.0 }
  0xf9   :  { %v601_v53 = vadd.f32 %v1564_v35, %v530_v43  ;;  %v633_v54 = vadd.f32 %v1564_v35, %v562_v44  ;;  %v662_v55 = vmax.f32 %v598_v47, 0.0  ;;  %v694_v56 = vmax.f32 %v630_v48, 0.0  ;;  %v1255_v3 = vpop.f32.mrb[16].mxu0 }
  0xfa   :  { %v599_v57 = vadd.f32 %v1564_v35, %v528_v49  ;;  %v631_v58 = vadd.f32 %v1564_v35, %v560_v50  ;;  %v1152_v59 = vpack.c.bf16 %v664_v51, %v664_v51  ;;  %v1184_v60 = vpack.c.bf16 %v696_v52, %v696_v52  ;;  %v1287_v4 = vpop.f32.mrb[16].mxu1  ;;  %v317_v9 = vpop.f32.mrb[17].mxu0 }
  0xfb   :  { %v665_v61 = vmax.f32 %v601_v53, 0.0  ;;  %v697_v62 = vmax.f32 %v633_v54, 0.0  ;;  %v1150_v63 = vpack.c.bf16 %v662_v55, %v662_v55  ;;  %v1182_v0 = vpack.c.bf16 %v694_v56, %v694_v56  ;;  %v445_v10 = vpop.f32.mrb[17].mxu1  ;;  %v1256_v15 = vpop.f32.mrb[18].mxu0 }
  0xfc   :  { %v663_v1 = vmax.f32 %v599_v57, 0.0  ;;  %v695_v2 = vmax.f32 %v631_v58, 0.0  ;;  %985 = vst.msk [vmem:[%s1954_s4 + $0x38] sm:$0xf] %vm970_vm1, %v1152_v59  ;;  %1017 = vst.msk [vmem:[%s1954_s4 + $0xb8] sm:$0xf] %vm970_vm1, %v1184_v60  ;;  %v533_v7 = vmul.f32 %v1255_v3, %v1559_v33  ;;  %v565_v8 = vmul.f32 %v1287_v4, %v1559_v33 }
  0xfd   :  { %v1153_v5 = vpack.c.bf16 %v665_v61, %v665_v61  ;;  %v1185_v6 = vpack.c.bf16 %v697_v62, %v697_v62  ;;  %983 = vst.msk [vmem:[%s1954_s4 + $0x30] sm:$0xf] %vm970_vm1, %v1150_v63  ;;  %1015 = vst.msk [vmem:[%s1954_s4 + $0xb0] sm:$0xf] %vm970_vm1, %v1182_v0  ;;  %v531_v13 = vmul.f32 %v1559_v33, %v317_v9  ;;  %v1288_v16 = vpop.f32.mrb[18].mxu1  ;;  %v320_v21 = vpop.f32.mrb[19].mxu0 }
  0xfe   :  { %v1151_v11 = vpack.c.bf16 %v663_v1, %v663_v1  ;;  %v1183_v12 = vpack.c.bf16 %v695_v2, %v695_v2  ;;  %v563_v14 = vmul.f32 %v1559_v33, %v445_v10  ;;  %v604_v17 = vadd.f32 %v1564_v35, %v533_v7  ;;  %v448_v22 = vpop.f32.mrb[19].mxu1 }
  0xff   :  { %986 = vst.msk [vmem:[%s1954_s4 + $0x3c] sm:$0xf] %vm970_vm1, %v1153_v5  ;;  %1018 = vst.msk [vmem:[%s1954_s4 + $0xbc] sm:$0xf] %vm970_vm1, %v1185_v6  ;;  %v636_v18 = vadd.f32 %v1564_v35, %v565_v8  ;;  %v534_v19 = vmul.f32 %v1256_v15, %v1559_v33  ;;  %v566_v20 = vmul.f32 %v1288_v16, %v1559_v33 }
 0x100   :  { %984 = vst.msk [vmem:[%s1954_s4 + $0x34] sm:$0xf] %vm970_vm1, %v1151_v11  ;;  %1016 = vst.msk [vmem:[%s1954_s4 + $0xb4] sm:$0xf] %vm970_vm1, %v1183_v12  ;;  %v602_v23 = vadd.f32 %v1564_v35, %v531_v13  ;;  %v634_v24 = vadd.f32 %v1564_v35, %v563_v14  ;;  %v532_v25 = vmul.f32 %v1559_v33, %v320_v21  ;;  %v668_v27 = vmax.f32 %v604_v17, 0.0 }
 0x101   :  { %v564_v26 = vmul.f32 %v1559_v33, %v448_v22  ;;  %v700_v28 = vmax.f32 %v636_v18, 0.0  ;;  %v605_v29 = vadd.f32 %v1564_v35, %v534_v19  ;;  %v637_v30 = vadd.f32 %v1564_v35, %v566_v20  ;;  %v1259_v45 = vpop.f32.mrb[20].mxu0 }
 0x102   :  { %v666_v31 = vmax.f32 %v602_v23, 0.0  ;;  %v698_v32 = vmax.f32 %v634_v24, 0.0  ;;  %v603_v34 = vadd.f32 %v1564_v35, %v532_v25  ;;  %v1156_v37 = vpack.c.bf16 %v668_v27, %v668_v27  ;;  %v1291_v46 = vpop.f32.mrb[20].mxu1  ;;  %v333_v51 = vpop.f32.mrb[21].mxu0 }
 0x103   :  { %v635_v36 = vadd.f32 %v1564_v35, %v564_v26  ;;  %v1188_v38 = vpack.c.bf16 %v700_v28, %v700_v28  ;;  %v669_v39 = vmax.f32 %v605_v29, 0.0  ;;  %v701_v40 = vmax.f32 %v637_v30, 0.0  ;;  %v461_v52 = vpop.f32.mrb[21].mxu1  ;;  %v1260_v57 = vpop.f32.mrb[22].mxu0 }
 0x104   :  { %v1154_v41 = vpack.c.bf16 %v666_v31, %v666_v31  ;;  %v1186_v42 = vpack.c.bf16 %v698_v32, %v698_v32  ;;  %v667_v43 = vmax.f32 %v603_v34, 0.0  ;;  %989 = vst.msk [vmem:[%s1954_s4 + $0x48] sm:$0xf] %vm970_vm1, %v1156_v37  ;;  %v537_v49 = vmul.f32 %v1259_v45, %v1559_v33  ;;  %v1292_v58 = vpop.f32.mrb[22].mxu1  ;;  %v336_v63 = vpop.f32.mrb[23].mxu0 }
 0x105   :  { %v699_v44 = vmax.f32 %v635_v36, 0.0  ;;  %1021 = vst.msk [vmem:[%s1954_s4 + $0xc8] sm:$0xf] %vm970_vm1, %v1188_v38  ;;  %v1157_v47 = vpack.c.bf16 %v669_v39, %v669_v39  ;;  %v1189_v48 = vpack.c.bf16 %v701_v40, %v701_v40  ;;  %v569_v50 = vmul.f32 %v1291_v46, %v1559_v33  ;;  %v464_v0 = vpop.f32.mrb[23].mxu1 }
 0x106   :  { %987 = vst.msk [vmem:[%s1954_s4 + $0x40] sm:$0xf] %vm970_vm1, %v1154_v41  ;;  %1019 = vst.msk [vmem:[%s1954_s4 + $0xc0] sm:$0xf] %vm970_vm1, %v1186_v42  ;;  %v1155_v53 = vpack.c.bf16 %v667_v43, %v667_v43  ;;  %v535_v55 = vmul.f32 %v1559_v33, %v333_v51  ;;  %v567_v56 = vmul.f32 %v1559_v33, %v461_v52 }
 0x107   :  { %v1187_v54 = vpack.c.bf16 %v699_v44, %v699_v44  ;;  %990 = vst.msk [vmem:[%s1954_s4 + $0x4c] sm:$0xf] %vm970_vm1, %v1157_v47  ;;  %1022 = vst.msk [vmem:[%s1954_s4 + $0xcc] sm:$0xf] %vm970_vm1, %v1189_v48  ;;  %v608_v59 = vadd.f32 %v1564_v35, %v537_v49  ;;  %v640_v60 = vadd.f32 %v1564_v35, %v569_v50 }
 0x108   :  { %v538_v61 = vmul.f32 %v1260_v57, %v1559_v33  ;;  %v570_v62 = vmul.f32 %v1292_v58, %v1559_v33  ;;  %988 = vst.msk [vmem:[%s1954_s4 + $0x44] sm:$0xf] %vm970_vm1, %v1155_v53  ;;  %v606_v1 = vadd.f32 %v1564_v35, %v535_v55  ;;  %v638_v2 = vadd.f32 %v1564_v35, %v567_v56 }
 0x109   :  { %1020 = vst.msk [vmem:[%s1954_s4 + $0xc4] sm:$0xf] %vm970_vm1, %v1187_v54  ;;  %v536_v3 = vmul.f32 %v1559_v33, %v336_v63  ;;  %v568_v4 = vmul.f32 %v1559_v33, %v464_v0  ;;  %v672_v5 = vmax.f32 %v608_v59, 0.0  ;;  %v704_v6 = vmax.f32 %v640_v60, 0.0  ;;  %v1263_v21 = vpop.f32.mrb[24].mxu0 }
 0x10a   :  { %v609_v7 = vadd.f32 %v1564_v35, %v538_v61  ;;  %v641_v8 = vadd.f32 %v1564_v35, %v570_v62  ;;  %v670_v9 = vmax.f32 %v606_v1, 0.0  ;;  %v702_v10 = vmax.f32 %v638_v2, 0.0  ;;  %v1295_v22 = vpop.f32.mrb[24].mxu1  ;;  %v349_v27 = vpop.f32.mrb[25].mxu0 }
 0x10b   :  { %v607_v11 = vadd.f32 %v1564_v35, %v536_v3  ;;  %v639_v12 = vadd.f32 %v1564_v35, %v568_v4  ;;  %v1160_v13 = vpack.c.bf16 %v672_v5, %v672_v5  ;;  %v1192_v14 = vpack.c.bf16 %v704_v6, %v704_v6  ;;  %v477_v28 = vpop.f32.mrb[25].mxu1  ;;  %v1264_v34 = vpop.f32.mrb[26].mxu0 }
 0x10c   :  { %v673_v15 = vmax.f32 %v609_v7, 0.0  ;;  %v705_v16 = vmax.f32 %v641_v8, 0.0  ;;  %v1158_v17 = vpack.c.bf16 %v670_v9, %v670_v9  ;;  %v1190_v18 = vpack.c.bf16 %v702_v10, %v702_v10  ;;  %v1296_v36 = vpop.f32.mrb[26].mxu1  ;;  %v352_v41 = vpop.f32.mrb[27].mxu0 }
 0x10d   :  { %v671_v19 = vmax.f32 %v607_v11, 0.0  ;;  %v703_v20 = vmax.f32 %v639_v12, 0.0  ;;  %993 = vst.msk [vmem:[%s1954_s4 + $0x58] sm:$0xf] %vm970_vm1, %v1160_v13  ;;  %1025 = vst.msk [vmem:[%s1954_s4 + $0xd8] sm:$0xf] %vm970_vm1, %v1192_v14  ;;  %v541_v25 = vmul.f32 %v1263_v21, %v1559_v33  ;;  %v573_v26 = vmul.f32 %v1295_v22, %v1559_v33 }
 0x10e   :  { %v1161_v23 = vpack.c.bf16 %v673_v15, %v673_v15  ;;  %v1193_v24 = vpack.c.bf16 %v705_v16, %v705_v16  ;;  %991 = vst.msk [vmem:[%s1954_s4 + $0x50] sm:$0xf] %vm970_vm1, %v1158_v17  ;;  %1023 = vst.msk [vmem:[%s1954_s4 + $0xd0] sm:$0xf] %vm970_vm1, %v1190_v18  ;;  %v539_v31 = vmul.f32 %v1559_v33, %v349_v27  ;;  %v480_v42 = vpop.f32.mrb[27].mxu1 }
 0x10f   :  { %v1159_v29 = vpack.c.bf16 %v671_v19, %v671_v19  ;;  %v1191_v30 = vpack.c.bf16 %v703_v20, %v703_v20  ;;  %v571_v32 = vmul.f32 %v1559_v33, %v477_v28  ;;  %v612_v37 = vadd.f32 %v1564_v35, %v541_v25 }
 0x110   :  { %994 = vst.msk [vmem:[%s1954_s4 + $0x5c] sm:$0xf] %vm970_vm1, %v1161_v23  ;;  %1026 = vst.msk [vmem:[%s1954_s4 + $0xdc] sm:$0xf] %vm970_vm1, %v1193_v24  ;;  %v644_v38 = vadd.f32 %v1564_v35, %v573_v26  ;;  %v542_v39 = vmul.f32 %v1264_v34, %v1559_v33  ;;  %v574_v40 = vmul.f32 %v1296_v36, %v1559_v33 }
 0x111   :  { %992 = vst.msk [vmem:[%s1954_s4 + $0x54] sm:$0xf] %vm970_vm1, %v1159_v29  ;;  %1024 = vst.msk [vmem:[%s1954_s4 + $0xd4] sm:$0xf] %vm970_vm1, %v1191_v30  ;;  %v610_v43 = vadd.f32 %v1564_v35, %v539_v31  ;;  %v642_v44 = vadd.f32 %v1564_v35, %v571_v32  ;;  %v540_v45 = vmul.f32 %v1559_v33, %v352_v41  ;;  %v676_v47 = vmax.f32 %v612_v37, 0.0  ;;  %v1267_v63 = vpop.f32.mrb[28].mxu0 }
 0x112   :  { %v572_v46 = vmul.f32 %v1559_v33, %v480_v42  ;;  %v708_v48 = vmax.f32 %v644_v38, 0.0  ;;  %v613_v49 = vadd.f32 %v1564_v35, %v542_v39  ;;  %v645_v50 = vadd.f32 %v1564_v35, %v574_v40  ;;  %v1299_v0 = vpop.f32.mrb[28].mxu1  ;;  %v365_v5 = vpop.f32.mrb[29].mxu0 }
 0x113   :  { %v674_v51 = vmax.f32 %v610_v43, 0.0  ;;  %v706_v52 = vmax.f32 %v642_v44, 0.0  ;;  %v611_v53 = vadd.f32 %v1564_v35, %v540_v45  ;;  %v1164_v55 = vpack.c.bf16 %v676_v47, %v676_v47  ;;  %v493_v6 = vpop.f32.mrb[29].mxu1  ;;  %v1268_v11 = vpop.f32.mrb[30].mxu0 }
 0x114   :  { %v643_v54 = vadd.f32 %v1564_v35, %v572_v46  ;;  %v1196_v56 = vpack.c.bf16 %v708_v48, %v708_v48  ;;  %v677_v57 = vmax.f32 %v613_v49, 0.0  ;;  %v709_v58 = vmax.f32 %v645_v50, 0.0  ;;  %v1300_v12 = vpop.f32.mrb[30].mxu1  ;;  %v368_v17 = vpop.f32.mrb[31].mxu0 }
 0x115   :  { %v1162_v59 = vpack.c.bf16 %v674_v51, %v674_v51  ;;  %v1194_v60 = vpack.c.bf16 %v706_v52, %v706_v52  ;;  %v675_v61 = vmax.f32 %v611_v53, 0.0  ;;  %997 = vst.msk [vmem:[%s1954_s4 + $0x68] sm:$0xf] %vm970_vm1, %v1164_v55  ;;  %v545_v3 = vmul.f32 %v1267_v63, %v1559_v33  ;;  %v496_v18 = vpop.f32.mrb[31].mxu1 }
 0x116   :  { %v707_v62 = vmax.f32 %v643_v54, 0.0  ;;  %1029 = vst.msk [vmem:[%s1954_s4 + $0xe8] sm:$0xf] %vm970_vm1, %v1196_v56  ;;  %v1165_v1 = vpack.c.bf16 %v677_v57, %v677_v57  ;;  %v1197_v2 = vpack.c.bf16 %v709_v58, %v709_v58  ;;  %v577_v4 = vmul.f32 %v1299_v0, %v1559_v33 }
 0x117   :  { %995 = vst.msk [vmem:[%s1954_s4 + $0x60] sm:$0xf] %vm970_vm1, %v1162_v59  ;;  %1027 = vst.msk [vmem:[%s1954_s4 + $0xe0] sm:$0xf] %vm970_vm1, %v1194_v60  ;;  %v1163_v7 = vpack.c.bf16 %v675_v61, %v675_v61  ;;  %v543_v9 = vmul.f32 %v1559_v33, %v365_v5  ;;  %v575_v10 = vmul.f32 %v1559_v33, %v493_v6 }
 0x118   :  { %v1195_v8 = vpack.c.bf16 %v707_v62, %v707_v62  ;;  %998 = vst.msk [vmem:[%s1954_s4 + $0x6c] sm:$0xf] %vm970_vm1, %v1165_v1  ;;  %1030 = vst.msk [vmem:[%s1954_s4 + $0xec] sm:$0xf] %vm970_vm1, %v1197_v2  ;;  %v616_v13 = vadd.f32 %v1564_v35, %v545_v3  ;;  %v648_v14 = vadd.f32 %v1564_v35, %v577_v4 }
 0x119   :  { %v546_v15 = vmul.f32 %v1268_v11, %v1559_v33  ;;  %v578_v16 = vmul.f32 %v1300_v12, %v1559_v33  ;;  %996 = vst.msk [vmem:[%s1954_s4 + $0x64] sm:$0xf] %vm970_vm1, %v1163_v7  ;;  %v614_v19 = vadd.f32 %v1564_v35, %v543_v9  ;;  %v646_v20 = vadd.f32 %v1564_v35, %v575_v10 }
 0x11a   :  { %1028 = vst.msk [vmem:[%s1954_s4 + $0xe4] sm:$0xf] %vm970_vm1, %v1195_v8  ;;  %v544_v21 = vmul.f32 %v1559_v33, %v368_v17  ;;  %v576_v22 = vmul.f32 %v1559_v33, %v496_v18  ;;  %v680_v23 = vmax.f32 %v616_v13, 0.0  ;;  %v712_v24 = vmax.f32 %v648_v14, 0.0 }
 0x11b   :  { %v617_v25 = vadd.f32 %v1564_v35, %v546_v15  ;;  %v649_v26 = vadd.f32 %v1564_v35, %v578_v16  ;;  %v678_v27 = vmax.f32 %v614_v19, 0.0  ;;  %v710_v28 = vmax.f32 %v646_v20, 0.0 }
 0x11c   :  { %v615_v29 = vadd.f32 %v1564_v35, %v544_v21  ;;  %v647_v30 = vadd.f32 %v1564_v35, %v576_v22  ;;  %v1168_v31 = vpack.c.bf16 %v680_v23, %v680_v23  ;;  %v1200_v32 = vpack.c.bf16 %v712_v24, %v712_v24 }
 0x11d   :  { %v681_v34 = vmax.f32 %v617_v25, 0.0  ;;  %v713_v36 = vmax.f32 %v649_v26, 0.0  ;;  %v1166_v37 = vpack.c.bf16 %v678_v27, %v678_v27  ;;  %v1198_v38 = vpack.c.bf16 %v710_v28, %v710_v28 }
 0x11e   :  { %v679_v39 = vmax.f32 %v615_v29, 0.0  ;;  %v711_v33 = vmax.f32 %v647_v30, 0.0  ;;  %1001 = vst.msk [vmem:[%s1954_s4 + $0x78] sm:$0xf] %vm970_vm1, %v1168_v31  ;;  %1033 = vst.msk [vmem:[%s1954_s4 + $0xf8] sm:$0xf] %vm970_vm1, %v1200_v32 }
 0x11f   :  { %v1169_v40 = vpack.c.bf16 %v681_v34, %v681_v34  ;;  %v1201_v35 = vpack.c.bf16 %v713_v36, %v713_v36  ;;  %999 = vst.msk [vmem:[%s1954_s4 + $0x70] sm:$0xf] %vm970_vm1, %v1166_v37  ;;  %1031 = vst.msk [vmem:[%s1954_s4 + $0xf0] sm:$0xf] %vm970_vm1, %v1198_v38 }
 0x120   :  { %v1167_v41 = vpack.c.bf16 %v679_v39, %v679_v39  ;;  %v1199_v42 = vpack.c.bf16 %v711_v33, %v711_v33 }
 0x121   :  { %1002 = vst.msk [vmem:[%s1954_s4 + $0x7c] sm:$0xf] %vm970_vm1, %v1169_v40  ;;  %1034 = vst.msk [vmem:[%s1954_s4 + $0xfc] sm:$0xf] %vm970_vm1, %v1201_v35 }
 0x122   :  { %1000 = vst.msk [vmem:[%s1954_s4 + $0x74] sm:$0xf] %vm970_vm1, %v1167_v41  ;;  %1032 = vst.msk [vmem:[%s1954_s4 + $0xf4] sm:$0xf] %vm970_vm1, %v1199_v42 }

</bundles_post_ra>
